<compile_context>
chip_gen: v7x
topology: tpu7x:2x2x1
jax: 0.10.0
libtpu: 0.0.40
codegen_flags: <defaults>
</compile_context>

<pallas_src>
import functools

import jax
import jax.numpy as jnp
from jax import lax
from jax.experimental import pallas as pl
from jax.experimental.pallas import tpu as pltpu


def _lstm_ts_kernel(x_ref, h0_ref, c0_ref, wih_ref, whh_ref, b_ref,
                    wfc_ref, bfc_ref,
                    out_ref, hn_ref, cn_ref,
                    hall_scr):
    """Full LSTM recurrence + fc2 + sigmoid in one kernel invocation."""
    seq = x_ref.shape[0]
    H = h0_ref.shape[1]

    # --- time-parallel work, hoisted off the recurrence critical path ---
    # (seq, 4H) = x @ W_ih^T + (b_ih + b_hh), computed once for all steps.
    gates_x = (jnp.dot(x_ref[...], wih_ref[...],
                       preferred_element_type=jnp.float32)
               + b_ref[...])                                   # (seq, 4H)

    # Lane mask selecting the "g" gate block (tanh) vs sigmoid gates.
    # Hoisted: broadcast_in_dim is not CSE'd by JAX, so build it once.
    lane = lax.broadcasted_iota(jnp.int32, (1, 4 * H), 1)
    g_mask = (lane >= 2 * H) & (lane < 3 * H)

    whh = whh_ref[...]                                         # (H, 4H)
    h = h0_ref[...]                                            # (1, H)
    c = c0_ref[...]                                            # (1, H)

    # --- fully-unrolled recurrence (seq is static and small) ---
    for t in range(seq):
        gates = gates_x[t:t + 1, :] + jnp.dot(
            h, whh, preferred_element_type=jnp.float32)        # (1, 4H)
        # 2 EUP passes over all 4H lanes + one select, instead of four
        # 32-lane sliced activations.
        acts = jnp.where(g_mask, jnp.tanh(gates), jax.nn.sigmoid(gates))
        i_g = acts[:, 0 * H:1 * H]
        f_g = acts[:, 1 * H:2 * H]
        g_g = acts[:, 2 * H:3 * H]
        o_g = acts[:, 3 * H:4 * H]

        c = f_g * c + i_g * g_g
        h = o_g * jnp.tanh(c)
        hall_scr[pl.ds(t, 1), :] = h                           # (1, H) store

    # --- deferred output projection: one matmul, one sigmoid, one store ---
    out_ref[...] = jax.nn.sigmoid(
        jnp.dot(hall_scr[...], wfc_ref[...],
                preferred_element_type=jnp.float32)
        + bfc_ref[...]).astype(out_ref.dtype)                  # (seq, O)

    hn_ref[...] = h
    cn_ref[...] = c


@functools.partial(jax.jit, static_argnames=())
def lstm_ts_forward(x, hprev, cprev, w_ih, w_hh, b_ih, b_hh, w_fc, b_fc):
    """Pallas wrapper reproducing LSTMTS.forward.

    x:      (seq, input_size)
    hprev:  (1, 1, hidden)   cprev: (1, 1, hidden)
    w_ih:   (4H, input)      w_hh:  (4H, H)
    b_ih:   (4H,)            b_hh:  (4H,)
    w_fc:   (out, H)         b_fc:  (out,)
    returns (out (seq, out_size), (h_n (1,1,H), c_n (1,1,H)))
    """
    seq, _ = x.shape
    hidden = w_hh.shape[1]
    out_size = w_fc.shape[0]

    h0 = hprev.reshape(1, hidden).astype(jnp.float32)
    c0 = cprev.reshape(1, hidden).astype(jnp.float32)
    wih_t = w_ih.T.astype(jnp.float32)                   # (I, 4H)
    whh_t = w_hh.T.astype(jnp.float32)                   # (H, 4H)
    bias = (b_ih + b_hh).reshape(1, 4 * hidden).astype(jnp.float32)
    wfc_t = w_fc.T.astype(jnp.float32)                   # (H, O)
    bfc = b_fc.reshape(1, out_size).astype(jnp.float32)

    vmem = pl.BlockSpec(memory_space=pltpu.MemorySpace.VMEM)

    # At these sizes everything (<~25 KB) lives untiled in VMEM; a seq-chunk
    # grid would only matter for very long sequences.
    out, h_n, c_n = pl.pallas_call(
        _lstm_ts_kernel,
        out_shape=(
            jax.ShapeDtypeStruct((seq, out_size), jnp.float32),
            jax.ShapeDtypeStruct((1, hidden), jnp.float32),
            jax.ShapeDtypeStruct((1, hidden), jnp.float32),
        ),
        in_specs=[vmem] * 8,
        out_specs=(vmem, vmem, vmem),
        scratch_shapes=[
            pltpu.VMEM((seq, hidden), jnp.float32),      # h_t for all steps
        ],
    )(x.astype(jnp.float32), h0, c0, wih_t, whh_t, bias, wfc_t, bfc)

    return out, (h_n.reshape(1, 1, hidden), c_n.reshape(1, 1, hidden))


def _reference_forward(x, hprev, cprev, w_ih, w_hh, b_ih, b_hh, w_fc, b_fc):
    """Pure-JAX reference matching torch.nn.LSTM semantics (gate order i,f,g,o)."""
    hidden = w_hh.shape[1]
    h = hprev.reshape(1, hidden)
    c = cprev.reshape(1, hidden)
    outs = []
    for t in range(x.shape[0]):
        x_t = x[t:t + 1, :]
        gates = x_t @ w_ih.T + b_ih + h @ w_hh.T + b_hh
        i_g = jax.nn.sigmoid(gates[:, 0 * hidden:1 * hidden])
        f_g = jax.nn.sigmoid(gates[:, 1 * hidden:2 * hidden])
        g_g = jnp.tanh(gates[:, 2 * hidden:3 * hidden])
        o_g = jax.nn.sigmoid(gates[:, 3 * hidden:4 * hidden])
        c = f_g * c + i_g * g_g
        h = o_g * jnp.tanh(c)
        outs.append(jax.nn.sigmoid(h @ w_fc.T + b_fc))
    return jnp.concatenate(outs, axis=0), (h.reshape(1, 1, hidden),
                                           c.reshape(1, 1, hidden))


if __name__ == "__main__":
    # config: input_size=8, hidden_layer_size=32, output_size=4, seq_len=8
    SEQ, IN, HID, OUT = 8, 8, 32, 4

    key = jax.random.PRNGKey(0)
    ks = jax.random.split(key, 10)

    x = jax.random.normal(ks[0], (SEQ, IN), jnp.float32)
    hprev = jax.random.normal(ks[1], (1, 1, HID), jnp.float32)
    cprev = jax.random.normal(ks[2], (1, 1, HID), jnp.float32)

    # Deterministic synthetic parameters (same shapes as nn.LSTM / nn.Linear).
    scale = 1.0 / jnp.sqrt(HID)
    w_ih = jax.random.uniform(ks[3], (4 * HID, IN), jnp.float32, -scale, scale)
    w_hh = jax.random.uniform(ks[4], (4 * HID, HID), jnp.float32, -scale, scale)
    b_ih = jax.random.uniform(ks[5], (4 * HID,), jnp.float32, -scale, scale)
    b_hh = jax.random.uniform(ks[6], (4 * HID,), jnp.float32, -scale, scale)
    w_fc = jax.random.uniform(ks[7], (OUT, HID), jnp.float32, -scale, scale)
    b_fc = jax.random.uniform(ks[8], (OUT,), jnp.float32, -scale, scale)

    out, (h_n, c_n) = lstm_ts_forward(x, hprev, cprev, w_ih, w_hh,
                                      b_ih, b_hh, w_fc, b_fc)
    jax.block_until_ready((out, h_n, c_n))

    ref_out, (ref_h, ref_c) = _reference_forward(x, hprev, cprev, w_ih, w_hh,
                                                 b_ih, b_hh, w_fc, b_fc)
    assert jnp.allclose(out, ref_out, atol=1e-5, rtol=1e-5)
    assert jnp.allclose(h_n, ref_h, atol=1e-5, rtol=1e-5)
    assert jnp.allclose(c_n, ref_c, atol=1e-5, rtol=1e-5)

    print("KERNEL_OK")
</pallas_src>

<mosaic_0001>
module attributes {stable_mosaic.version = 11 : i64} {
  func.func @_lstm_ts_kernel(%arg0: memref<8x8xf32, #tpu.memory_space<vmem>>, %arg1: memref<1x32xf32, #tpu.memory_space<vmem>>, %arg2: memref<1x32xf32, #tpu.memory_space<vmem>>, %arg3: memref<8x128xf32, #tpu.memory_space<vmem>>, %arg4: memref<32x128xf32, #tpu.memory_space<vmem>>, %arg5: memref<1x128xf32, #tpu.memory_space<vmem>>, %arg6: memref<32x4xf32, #tpu.memory_space<vmem>>, %arg7: memref<1x4xf32, #tpu.memory_space<vmem>>, %arg8: memref<8x4xf32, #tpu.memory_space<vmem>>, %arg9: memref<1x32xf32, #tpu.memory_space<vmem>>, %arg10: memref<1x32xf32, #tpu.memory_space<vmem>>, %arg11: memref<8x32xf32, #tpu.memory_space<vmem>>) attributes {dimension_semantics = [], scalar_prefetch = 0 : i64, scratch_operands = 1 : i64, tpu.core_type = #tpu.core_type<tc>} {
    %c0 = arith.constant 0 : index
    %c0_0 = arith.constant 0 : index
    %0 = vector.load %arg0[%c0, %c0_0] : memref<8x8xf32, #tpu.memory_space<vmem>>, vector<8x8xf32>
    %c0_1 = arith.constant 0 : index
    %c0_2 = arith.constant 0 : index
    %1 = vector.load %arg3[%c0_1, %c0_2] : memref<8x128xf32, #tpu.memory_space<vmem>>, vector<8x128xf32>
    %cst = arith.constant dense<0.000000e+00> : vector<8x128xf32>
    %2 = tpu.matmul %0, %1, %cst {dimension_numbers = #tpu.dot_dimension_numbers<[1], [0], [0], [1], [0, 0, 1, 1], [], []>} : vector<8x8xf32>, vector<8x128xf32>, vector<8x128xf32> -> vector<8x128xf32>
    %c0_3 = arith.constant 0 : index
    %c0_4 = arith.constant 0 : index
    %3 = vector.load %arg5[%c0_3, %c0_4] : memref<1x128xf32, #tpu.memory_space<vmem>>, vector<1x128xf32>
    %4 = vector.broadcast %3 : vector<1x128xf32> to vector<8x128xf32>
    %5 = arith.addf %2, %4 : vector<8x128xf32>
    %6 = tpu.iota {dimensions = array<i32: 1>} : vector<1x128xi32>
    %c64_i32 = arith.constant 64 : i32
    %7 = vector.broadcast %c64_i32 : i32 to vector<1x128xi32>
    %8 = arith.cmpi sge, %6, %7 : vector<1x128xi32>
    %c96_i32 = arith.constant 96 : i32
    %9 = vector.broadcast %c96_i32 : i32 to vector<1x128xi32>
    %10 = arith.cmpi slt, %6, %9 : vector<1x128xi32>
    %11 = arith.andi %8, %10 : vector<1x128xi1>
    %c0_5 = arith.constant 0 : index
    %c0_6 = arith.constant 0 : index
    %12 = vector.load %arg4[%c0_5, %c0_6] : memref<32x128xf32, #tpu.memory_space<vmem>>, vector<32x128xf32>
    %c0_7 = arith.constant 0 : index
    %c0_8 = arith.constant 0 : index
    %13 = vector.load %arg1[%c0_7, %c0_8] : memref<1x32xf32, #tpu.memory_space<vmem>>, vector<1x32xf32>
    %c0_9 = arith.constant 0 : index
    %c0_10 = arith.constant 0 : index
    %14 = vector.load %arg2[%c0_9, %c0_10] : memref<1x32xf32, #tpu.memory_space<vmem>>, vector<1x32xf32>
    %15 = vector.extract_strided_slice %5 {offsets = [0, 0], sizes = [1, 128], strides = [1, 1]} : vector<8x128xf32> to vector<1x128xf32>
    %cst_11 = arith.constant dense<0.000000e+00> : vector<1x128xf32>
    %16 = tpu.matmul %13, %12, %cst_11 {dimension_numbers = #tpu.dot_dimension_numbers<[1], [0], [0], [1], [0, 0, 1, 1], [], []>} : vector<1x32xf32>, vector<32x128xf32>, vector<1x128xf32> -> vector<1x128xf32>
    %17 = arith.addf %15, %16 : vector<1x128xf32>
    %18 = math.tanh %17 : vector<1x128xf32>
    %19 = arith.negf %17 : vector<1x128xf32>
    %20 = math.exp %19 : vector<1x128xf32>
    %cst_12 = arith.constant 1.000000e+00 : f32
    %21 = vector.broadcast %cst_12 : f32 to vector<1x128xf32>
    %22 = arith.addf %21, %20 : vector<1x128xf32>
    %23 = arith.divf %21, %22 : vector<1x128xf32>
    %24 = arith.select %11, %18, %23 : vector<1x128xi1>, vector<1x128xf32>
    %25 = vector.extract_strided_slice %24 {offsets = [0, 0], sizes = [1, 32], strides = [1, 1]} : vector<1x128xf32> to vector<1x32xf32>
    %26 = vector.extract_strided_slice %24 {offsets = [0, 32], sizes = [1, 32], strides = [1, 1]} : vector<1x128xf32> to vector<1x32xf32>
    %27 = vector.extract_strided_slice %24 {offsets = [0, 64], sizes = [1, 32], strides = [1, 1]} : vector<1x128xf32> to vector<1x32xf32>
    %28 = vector.extract_strided_slice %24 {offsets = [0, 96], sizes = [1, 32], strides = [1, 1]} : vector<1x128xf32> to vector<1x32xf32>
    %29 = arith.mulf %26, %14 : vector<1x32xf32>
    %30 = arith.mulf %25, %27 : vector<1x32xf32>
    %31 = arith.addf %29, %30 : vector<1x32xf32>
    %32 = math.tanh %31 : vector<1x32xf32>
    %33 = arith.mulf %28, %32 : vector<1x32xf32>
    %c0_13 = arith.constant 0 : index
    %c0_14 = arith.constant 0 : index
    %34 = vector.load %arg11[%c0_13, %c0_14] : memref<8x32xf32, #tpu.memory_space<vmem>>, vector<1x32xf32>
    tpu.vector_store %arg11[%c0_13, %c0_14], %33 {strides = array<i32>} : memref<8x32xf32, #tpu.memory_space<vmem>>, vector<1x32xf32>,
    %35 = vector.extract_strided_slice %5 {offsets = [1, 0], sizes = [1, 128], strides = [1, 1]} : vector<8x128xf32> to vector<1x128xf32>
    %cst_15 = arith.constant dense<0.000000e+00> : vector<1x128xf32>
    %36 = tpu.matmul %33, %12, %cst_15 {dimension_numbers = #tpu.dot_dimension_numbers<[1], [0], [0], [1], [0, 0, 1, 1], [], []>} : vector<1x32xf32>, vector<32x128xf32>, vector<1x128xf32> -> vector<1x128xf32>
    %37 = arith.addf %35, %36 : vector<1x128xf32>
    %38 = math.tanh %37 : vector<1x128xf32>
    %39 = arith.negf %37 : vector<1x128xf32>
    %40 = math.exp %39 : vector<1x128xf32>
    %cst_16 = arith.constant 1.000000e+00 : f32
    %41 = vector.broadcast %cst_16 : f32 to vector<1x128xf32>
    %42 = arith.addf %41, %40 : vector<1x128xf32>
    %43 = arith.divf %41, %42 : vector<1x128xf32>
    %44 = arith.select %11, %38, %43 : vector<1x128xi1>, vector<1x128xf32>
    %45 = vector.extract_strided_slice %44 {offsets = [0, 0], sizes = [1, 32], strides = [1, 1]} : vector<1x128xf32> to vector<1x32xf32>
    %46 = vector.extract_strided_slice %44 {offsets = [0, 32], sizes = [1, 32], strides = [1, 1]} : vector<1x128xf32> to vector<1x32xf32>
    %47 = vector.extract_strided_slice %44 {offsets = [0, 64], sizes = [1, 32], strides = [1, 1]} : vector<1x128xf32> to vector<1x32xf32>
    %48 = vector.extract_strided_slice %44 {offsets = [0, 96], sizes = [1, 32], strides = [1, 1]} : vector<1x128xf32> to vector<1x32xf32>
    %49 = arith.mulf %46, %31 : vector<1x32xf32>
    %50 = arith.mulf %45, %47 : vector<1x32xf32>
    %51 = arith.addf %49, %50 : vector<1x32xf32>
    %52 = math.tanh %51 : vector<1x32xf32>
    %53 = arith.mulf %48, %52 : vector<1x32xf32>
    %c1 = arith.constant 1 : index
    %c0_17 = arith.constant 0 : index
    %54 = vector.load %arg11[%c1, %c0_17] : memref<8x32xf32, #tpu.memory_space<vmem>>, vector<1x32xf32>
    tpu.vector_store %arg11[%c1, %c0_17], %53 {strides = array<i32>} : memref<8x32xf32, #tpu.memory_space<vmem>>, vector<1x32xf32>,
    %55 = vector.extract_strided_slice %5 {offsets = [2, 0], sizes = [1, 128], strides = [1, 1]} : vector<8x128xf32> to vector<1x128xf32>
    %cst_18 = arith.constant dense<0.000000e+00> : vector<1x128xf32>
    %56 = tpu.matmul %53, %12, %cst_18 {dimension_numbers = #tpu.dot_dimension_numbers<[1], [0], [0], [1], [0, 0, 1, 1], [], []>} : vector<1x32xf32>, vector<32x128xf32>, vector<1x128xf32> -> vector<1x128xf32>
    %57 = arith.addf %55, %56 : vector<1x128xf32>
    %58 = math.tanh %57 : vector<1x128xf32>
    %59 = arith.negf %57 : vector<1x128xf32>
    %60 = math.exp %59 : vector<1x128xf32>
    %cst_19 = arith.constant 1.000000e+00 : f32
    %61 = vector.broadcast %cst_19 : f32 to vector<1x128xf32>
    %62 = arith.addf %61, %60 : vector<1x128xf32>
    %63 = arith.divf %61, %62 : vector<1x128xf32>
    %64 = arith.select %11, %58, %63 : vector<1x128xi1>, vector<1x128xf32>
    %65 = vector.extract_strided_slice %64 {offsets = [0, 0], sizes = [1, 32], strides = [1, 1]} : vector<1x128xf32> to vector<1x32xf32>
    %66 = vector.extract_strided_slice %64 {offsets = [0, 32], sizes = [1, 32], strides = [1, 1]} : vector<1x128xf32> to vector<1x32xf32>
    %67 = vector.extract_strided_slice %64 {offsets = [0, 64], sizes = [1, 32], strides = [1, 1]} : vector<1x128xf32> to vector<1x32xf32>
    %68 = vector.extract_strided_slice %64 {offsets = [0, 96], sizes = [1, 32], strides = [1, 1]} : vector<1x128xf32> to vector<1x32xf32>
    %69 = arith.mulf %66, %51 : vector<1x32xf32>
    %70 = arith.mulf %65, %67 : vector<1x32xf32>
    %71 = arith.addf %69, %70 : vector<1x32xf32>
    %72 = math.tanh %71 : vector<1x32xf32>
    %73 = arith.mulf %68, %72 : vector<1x32xf32>
    %c2 = arith.constant 2 : index
    %c0_20 = arith.constant 0 : index
    %74 = vector.load %arg11[%c2, %c0_20] : memref<8x32xf32, #tpu.memory_space<vmem>>, vector<1x32xf32>
    tpu.vector_store %arg11[%c2, %c0_20], %73 {strides = array<i32>} : memref<8x32xf32, #tpu.memory_space<vmem>>, vector<1x32xf32>,
    %75 = vector.extract_strided_slice %5 {offsets = [3, 0], sizes = [1, 128], strides = [1, 1]} : vector<8x128xf32> to vector<1x128xf32>
    %cst_21 = arith.constant dense<0.000000e+00> : vector<1x128xf32>
    %76 = tpu.matmul %73, %12, %cst_21 {dimension_numbers = #tpu.dot_dimension_numbers<[1], [0], [0], [1], [0, 0, 1, 1], [], []>} : vector<1x32xf32>, vector<32x128xf32>, vector<1x128xf32> -> vector<1x128xf32>
    %77 = arith.addf %75, %76 : vector<1x128xf32>
    %78 = math.tanh %77 : vector<1x128xf32>
    %79 = arith.negf %77 : vector<1x128xf32>
    %80 = math.exp %79 : vector<1x128xf32>
    %cst_22 = arith.constant 1.000000e+00 : f32
    %81 = vector.broadcast %cst_22 : f32 to vector<1x128xf32>
    %82 = arith.addf %81, %80 : vector<1x128xf32>
    %83 = arith.divf %81, %82 : vector<1x128xf32>
    %84 = arith.select %11, %78, %83 : vector<1x128xi1>, vector<1x128xf32>
    %85 = vector.extract_strided_slice %84 {offsets = [0, 0], sizes = [1, 32], strides = [1, 1]} : vector<1x128xf32> to vector<1x32xf32>
    %86 = vector.extract_strided_slice %84 {offsets = [0, 32], sizes = [1, 32], strides = [1, 1]} : vector<1x128xf32> to vector<1x32xf32>
    %87 = vector.extract_strided_slice %84 {offsets = [0, 64], sizes = [1, 32], strides = [1, 1]} : vector<1x128xf32> to vector<1x32xf32>
    %88 = vector.extract_strided_slice %84 {offsets = [0, 96], sizes = [1, 32], strides = [1, 1]} : vector<1x128xf32> to vector<1x32xf32>
    %89 = arith.mulf %86, %71 : vector<1x32xf32>
    %90 = arith.mulf %85, %87 : vector<1x32xf32>
    %91 = arith.addf %89, %90 : vector<1x32xf32>
    %92 = math.tanh %91 : vector<1x32xf32>
    %93 = arith.mulf %88, %92 : vector<1x32xf32>
    %c3 = arith.constant 3 : index
    %c0_23 = arith.constant 0 : index
    %94 = vector.load %arg11[%c3, %c0_23] : memref<8x32xf32, #tpu.memory_space<vmem>>, vector<1x32xf32>
    tpu.vector_store %arg11[%c3, %c0_23], %93 {strides = array<i32>} : memref<8x32xf32, #tpu.memory_space<vmem>>, vector<1x32xf32>,
    %95 = vector.extract_strided_slice %5 {offsets = [4, 0], sizes = [1, 128], strides = [1, 1]} : vector<8x128xf32> to vector<1x128xf32>
    %cst_24 = arith.constant dense<0.000000e+00> : vector<1x128xf32>
    %96 = tpu.matmul %93, %12, %cst_24 {dimension_numbers = #tpu.dot_dimension_numbers<[1], [0], [0], [1], [0, 0, 1, 1], [], []>} : vector<1x32xf32>, vector<32x128xf32>, vector<1x128xf32> -> vector<1x128xf32>
    %97 = arith.addf %95, %96 : vector<1x128xf32>
    %98 = math.tanh %97 : vector<1x128xf32>
    %99 = arith.negf %97 : vector<1x128xf32>
    %100 = math.exp %99 : vector<1x128xf32>
    %cst_25 = arith.constant 1.000000e+00 : f32
    %101 = vector.broadcast %cst_25 : f32 to vector<1x128xf32>
    %102 = arith.addf %101, %100 : vector<1x128xf32>
    %103 = arith.divf %101, %102 : vector<1x128xf32>
    %104 = arith.select %11, %98, %103 : vector<1x128xi1>, vector<1x128xf32>
    %105 = vector.extract_strided_slice %104 {offsets = [0, 0], sizes = [1, 32], strides = [1, 1]} : vector<1x128xf32> to vector<1x32xf32>
    %106 = vector.extract_strided_slice %104 {offsets = [0, 32], sizes = [1, 32], strides = [1, 1]} : vector<1x128xf32> to vector<1x32xf32>
    %107 = vector.extract_strided_slice %104 {offsets = [0, 64], sizes = [1, 32], strides = [1, 1]} : vector<1x128xf32> to vector<1x32xf32>
    %108 = vector.extract_strided_slice %104 {offsets = [0, 96], sizes = [1, 32], strides = [1, 1]} : vector<1x128xf32> to vector<1x32xf32>
    %109 = arith.mulf %106, %91 : vector<1x32xf32>
    %110 = arith.mulf %105, %107 : vector<1x32xf32>
    %111 = arith.addf %109, %110 : vector<1x32xf32>
    %112 = math.tanh %111 : vector<1x32xf32>
    %113 = arith.mulf %108, %112 : vector<1x32xf32>
    %c4 = arith.constant 4 : index
    %c0_26 = arith.constant 0 : index
    %114 = vector.load %arg11[%c4, %c0_26] : memref<8x32xf32, #tpu.memory_space<vmem>>, vector<1x32xf32>
    tpu.vector_store %arg11[%c4, %c0_26], %113 {strides = array<i32>} : memref<8x32xf32, #tpu.memory_space<vmem>>, vector<1x32xf32>,
    %115 = vector.extract_strided_slice %5 {offsets = [5, 0], sizes = [1, 128], strides = [1, 1]} : vector<8x128xf32> to vector<1x128xf32>
    %cst_27 = arith.constant dense<0.000000e+00> : vector<1x128xf32>
    %116 = tpu.matmul %113, %12, %cst_27 {dimension_numbers = #tpu.dot_dimension_numbers<[1], [0], [0], [1], [0, 0, 1, 1], [], []>} : vector<1x32xf32>, vector<32x128xf32>, vector<1x128xf32> -> vector<1x128xf32>
    %117 = arith.addf %115, %116 : vector<1x128xf32>
    %118 = math.tanh %117 : vector<1x128xf32>
    %119 = arith.negf %117 : vector<1x128xf32>
    %120 = math.exp %119 : vector<1x128xf32>
    %cst_28 = arith.constant 1.000000e+00 : f32
    %121 = vector.broadcast %cst_28 : f32 to vector<1x128xf32>
    %122 = arith.addf %121, %120 : vector<1x128xf32>
    %123 = arith.divf %121, %122 : vector<1x128xf32>
    %124 = arith.select %11, %118, %123 : vector<1x128xi1>, vector<1x128xf32>
    %125 = vector.extract_strided_slice %124 {offsets = [0, 0], sizes = [1, 32], strides = [1, 1]} : vector<1x128xf32> to vector<1x32xf32>
    %126 = vector.extract_strided_slice %124 {offsets = [0, 32], sizes = [1, 32], strides = [1, 1]} : vector<1x128xf32> to vector<1x32xf32>
    %127 = vector.extract_strided_slice %124 {offsets = [0, 64], sizes = [1, 32], strides = [1, 1]} : vector<1x128xf32> to vector<1x32xf32>
    %128 = vector.extract_strided_slice %124 {offsets = [0, 96], sizes = [1, 32], strides = [1, 1]} : vector<1x128xf32> to vector<1x32xf32>
    %129 = arith.mulf %126, %111 : vector<1x32xf32>
    %130 = arith.mulf %125, %127 : vector<1x32xf32>
    %131 = arith.addf %129, %130 : vector<1x32xf32>
    %132 = math.tanh %131 : vector<1x32xf32>
    %133 = arith.mulf %128, %132 : vector<1x32xf32>
    %c5 = arith.constant 5 : index
    %c0_29 = arith.constant 0 : index
    %134 = vector.load %arg11[%c5, %c0_29] : memref<8x32xf32, #tpu.memory_space<vmem>>, vector<1x32xf32>
    tpu.vector_store %arg11[%c5, %c0_29], %133 {strides = array<i32>} : memref<8x32xf32, #tpu.memory_space<vmem>>, vector<1x32xf32>,
    %135 = vector.extract_strided_slice %5 {offsets = [6, 0], sizes = [1, 128], strides = [1, 1]} : vector<8x128xf32> to vector<1x128xf32>
    %cst_30 = arith.constant dense<0.000000e+00> : vector<1x128xf32>
    %136 = tpu.matmul %133, %12, %cst_30 {dimension_numbers = #tpu.dot_dimension_numbers<[1], [0], [0], [1], [0, 0, 1, 1], [], []>} : vector<1x32xf32>, vector<32x128xf32>, vector<1x128xf32> -> vector<1x128xf32>
    %137 = arith.addf %135, %136 : vector<1x128xf32>
    %138 = math.tanh %137 : vector<1x128xf32>
    %139 = arith.negf %137 : vector<1x128xf32>
    %140 = math.exp %139 : vector<1x128xf32>
    %cst_31 = arith.constant 1.000000e+00 : f32
    %141 = vector.broadcast %cst_31 : f32 to vector<1x128xf32>
    %142 = arith.addf %141, %140 : vector<1x128xf32>
    %143 = arith.divf %141, %142 : vector<1x128xf32>
    %144 = arith.select %11, %138, %143 : vector<1x128xi1>, vector<1x128xf32>
    %145 = vector.extract_strided_slice %144 {offsets = [0, 0], sizes = [1, 32], strides = [1, 1]} : vector<1x128xf32> to vector<1x32xf32>
    %146 = vector.extract_strided_slice %144 {offsets = [0, 32], sizes = [1, 32], strides = [1, 1]} : vector<1x128xf32> to vector<1x32xf32>
    %147 = vector.extract_strided_slice %144 {offsets = [0, 64], sizes = [1, 32], strides = [1, 1]} : vector<1x128xf32> to vector<1x32xf32>
    %148 = vector.extract_strided_slice %144 {offsets = [0, 96], sizes = [1, 32], strides = [1, 1]} : vector<1x128xf32> to vector<1x32xf32>
    %149 = arith.mulf %146, %131 : vector<1x32xf32>
    %150 = arith.mulf %145, %147 : vector<1x32xf32>
    %151 = arith.addf %149, %150 : vector<1x32xf32>
    %152 = math.tanh %151 : vector<1x32xf32>
    %153 = arith.mulf %148, %152 : vector<1x32xf32>
    %c6 = arith.constant 6 : index
    %c0_32 = arith.constant 0 : index
    %154 = vector.load %arg11[%c6, %c0_32] : memref<8x32xf32, #tpu.memory_space<vmem>>, vector<1x32xf32>
    tpu.vector_store %arg11[%c6, %c0_32], %153 {strides = array<i32>} : memref<8x32xf32, #tpu.memory_space<vmem>>, vector<1x32xf32>,
    %155 = vector.extract_strided_slice %5 {offsets = [7, 0], sizes = [1, 128], strides = [1, 1]} : vector<8x128xf32> to vector<1x128xf32>
    %cst_33 = arith.constant dense<0.000000e+00> : vector<1x128xf32>
    %156 = tpu.matmul %153, %12, %cst_33 {dimension_numbers = #tpu.dot_dimension_numbers<[1], [0], [0], [1], [0, 0, 1, 1], [], []>} : vector<1x32xf32>, vector<32x128xf32>, vector<1x128xf32> -> vector<1x128xf32>
    %157 = arith.addf %155, %156 : vector<1x128xf32>
    %158 = math.tanh %157 : vector<1x128xf32>
    %159 = arith.negf %157 : vector<1x128xf32>
    %160 = math.exp %159 : vector<1x128xf32>
    %cst_34 = arith.constant 1.000000e+00 : f32
    %161 = vector.broadcast %cst_34 : f32 to vector<1x128xf32>
    %162 = arith.addf %161, %160 : vector<1x128xf32>
    %163 = arith.divf %161, %162 : vector<1x128xf32>
    %164 = arith.select %11, %158, %163 : vector<1x128xi1>, vector<1x128xf32>
    %165 = vector.extract_strided_slice %164 {offsets = [0, 0], sizes = [1, 32], strides = [1, 1]} : vector<1x128xf32> to vector<1x32xf32>
    %166 = vector.extract_strided_slice %164 {offsets = [0, 32], sizes = [1, 32], strides = [1, 1]} : vector<1x128xf32> to vector<1x32xf32>
    %167 = vector.extract_strided_slice %164 {offsets = [0, 64], sizes = [1, 32], strides = [1, 1]} : vector<1x128xf32> to vector<1x32xf32>
    %168 = vector.extract_strided_slice %164 {offsets = [0, 96], sizes = [1, 32], strides = [1, 1]} : vector<1x128xf32> to vector<1x32xf32>
    %169 = arith.mulf %166, %151 : vector<1x32xf32>
    %170 = arith.mulf %165, %167 : vector<1x32xf32>
    %171 = arith.addf %169, %170 : vector<1x32xf32>
    %172 = math.tanh %171 : vector<1x32xf32>
    %173 = arith.mulf %168, %172 : vector<1x32xf32>
    %c7 = arith.constant 7 : index
    %c0_35 = arith.constant 0 : index
    %174 = vector.load %arg11[%c7, %c0_35] : memref<8x32xf32, #tpu.memory_space<vmem>>, vector<1x32xf32>
    tpu.vector_store %arg11[%c7, %c0_35], %173 {strides = array<i32>} : memref<8x32xf32, #tpu.memory_space<vmem>>, vector<1x32xf32>,
    %c0_36 = arith.constant 0 : index
    %c0_37 = arith.constant 0 : index
    %175 = vector.load %arg11[%c0_36, %c0_37] : memref<8x32xf32, #tpu.memory_space<vmem>>, vector<8x32xf32>
    %c0_38 = arith.constant 0 : index
    %c0_39 = arith.constant 0 : index
    %176 = vector.load %arg6[%c0_38, %c0_39] : memref<32x4xf32, #tpu.memory_space<vmem>>, vector<32x4xf32>
    %cst_40 = arith.constant dense<0.000000e+00> : vector<8x4xf32>
    %177 = tpu.matmul %175, %176, %cst_40 {dimension_numbers = #tpu.dot_dimension_numbers<[1], [0], [0], [1], [0, 0, 1, 1], [], []>} : vector<8x32xf32>, vector<32x4xf32>, vector<8x4xf32> -> vector<8x4xf32>
    %c0_41 = arith.constant 0 : index
    %c0_42 = arith.constant 0 : index
    %178 = vector.load %arg7[%c0_41, %c0_42] : memref<1x4xf32, #tpu.memory_space<vmem>>, vector<1x4xf32>
    %179 = vector.broadcast %178 : vector<1x4xf32> to vector<8x4xf32>
    %180 = arith.addf %177, %179 : vector<8x4xf32>
    %181 = arith.negf %180 : vector<8x4xf32>
    %182 = math.exp %181 : vector<8x4xf32>
    %cst_43 = arith.constant 1.000000e+00 : f32
    %183 = vector.broadcast %cst_43 : f32 to vector<8x4xf32>
    %184 = arith.addf %183, %182 : vector<8x4xf32>
    %185 = arith.divf %183, %184 : vector<8x4xf32>
    %c0_44 = arith.constant 0 : index
    %c0_45 = arith.constant 0 : index
    %186 = vector.load %arg8[%c0_44, %c0_45] : memref<8x4xf32, #tpu.memory_space<vmem>>, vector<8x4xf32>
    tpu.vector_store %arg8[%c0_44, %c0_45], %185 {strides = array<i32>} : memref<8x4xf32, #tpu.memory_space<vmem>>, vector<8x4xf32>,
    %c0_46 = arith.constant 0 : index
    %c0_47 = arith.constant 0 : index
    %187 = vector.load %arg9[%c0_46, %c0_47] : memref<1x32xf32, #tpu.memory_space<vmem>>, vector<1x32xf32>
    tpu.vector_store %arg9[%c0_46, %c0_47], %173 {strides = array<i32>} : memref<1x32xf32, #tpu.memory_space<vmem>>, vector<1x32xf32>,
    %c0_48 = arith.constant 0 : index
    %c0_49 = arith.constant 0 : index
    %188 = vector.load %arg10[%c0_48, %c0_49] : memref<1x32xf32, #tpu.memory_space<vmem>>, vector<1x32xf32>
    tpu.vector_store %arg10[%c0_48, %c0_49], %171 {strides = array<i32>} : memref<1x32xf32, #tpu.memory_space<vmem>>, vector<1x32xf32>,
    return
  }
}

</mosaic_0001>

<bundles_post_ra>
// kernel: lstm_ts_forward.1
= control target key start
LH: loop header
LB: loop body
LE: loop exit
PB: predicated region body
PF: predicated region fallthrough
CT: control target
= control target key end

     0   :  { %16 = vsyncpa [#allocation4], 0  ;;  %v1512_v3 = vmov 0.0|0.0   ;;  %v1513_v5 = vmov 0.0   ;;  %vm43_vm0 = vcmask 64512   ;;  %vm1514_vm1 = vmmov 0   ;;  %s1797_s0 = inlined_call_operand.vmem [shape: f32[8,8], index: 0, kind: input, shape index: {}]   ;;  %s1798_s1 = inlined_call_operand.vmem [shape: f32[1,32], index: 1, kind: input, shape index: {}]   ;;  %s1799_s2 = inlined_call_operand.vmem [shape: f32[1,32], index: 2, kind: input, shape index: {}]   ;;  %s1800_s3 = inlined_call_operand.vmem [shape: f32[8,128], index: 3, kind: input, shape index: {}]   ;;  %s1801_s4 = inlined_call_operand.vmem [shape: f32[32,128], index: 4, kind: input, shape index: {}]   ;;  %s1802_s5 = inlined_call_operand.vmem [shape: f32[1,128], index: 5, kind: input, shape index: {}]   ;;  %s1803_s6 = inlined_call_operand.vmem [shape: f32[32,4], index: 6, kind: input, shape index: {}]   ;;  %s1804_s7 = inlined_call_operand.vmem [shape: f32[1,4], index: 7, kind: input, shape index: {}]   ;;  %s1805_s8 = inlined_call_operand.vmem [shape: f32[8,4], index: 8, kind: output, shape index: {0}]   ;;  %s1806_s9 = inlined_call_operand.hbm [shape: f32[1,32], index: 9, kind: output, shape index: {1}]   ;;  %s1807_s10 = inlined_call_operand.hbm [shape: f32[1,32], index: 10, kind: output, shape index: {2}]  }
   0x1   :  { %v122_v0 = vld [vmem:[%s1801_s4] sm:$0xff]  ;;  %v123_v1 = vld [vmem:[%s1801_s4 + $0x8] sm:$0xff]  ;;  %1334 = vmatprep.subr.bf16.mxu1 %v1512_v3  ;;  %1230 = vmatprep.subr.mxu0 %v1513_v5  ;;  %v124_v7 = vld [vmem:[%s1801_s4 + $0x10] sm:$0xff] }
   0x2   :  { %v35_v2 = vld [vmem:[%s1800_s3] sm:$0xff]  ;;  %v1585_v4 = vpack.c.bf16 %v123_v1, %v122_v0  ;;  %v125_v8 = vld [vmem:[%s1801_s4 + $0x18] sm:$0xff]  ;;  %1232 = vmatprep.mubr.msk.f32.mxu0 %vm1514_vm1, %v1513_v5 }
   0x3   :  { %v34_v6 = vld [vmem:[%s1797_s0] sm:$0xff]  ;;  %1231 = vmatpush3.msra.mxu0 %v35_v2 }
   0x4   :  { %17 = vsyncpa [#allocation6], 0  ;;  %1336 = vmatpush3.bf16.msra.mxu1 %v1585_v4  ;;  %1233 = vmatmul.mubr.msk.f32.vlgmr.msra.gmra.mrb[0].mxu0 %vm43_vm0, %v34_v6  ;;  %v1600_v9 = vpack.c.bf16 %v125_v8, %v124_v7  ;;  %v126_v10 = vld [vmem:[%s1798_s1] sm:$0x1]  ;;  %vm128_vm2 = vcmask 261120   ;;  %v117_v20 = vlaneseq  ;;  %s1516_s27 = smov 32  }
   0x5   :  { %1337 = vmatprep.subr.bf16.mxu1 %v1512_v3  ;;  %1243 = vmatprep.mubr.msk.f32.mxu1 %vm1514_vm1, %v1513_v5  ;;  %v1161_v12 = vld [vmem:[%s1802_s5] ss:$0 sm:$0xff]  ;;  %s1515_s5 = smov 64   ;;  %vm240_vm6 = vcmask 253952   ;;  %vm350_vm7 = vcmask 254977   ;;  %vm576_vm8 = vcmask 257027  }
   0x6   :  { %1340 = vmatprep.subr.bf16.mxu0 %v1512_v3  ;;  %1254 = vmatprep.mubr.msk.f32.mxu0 %vm1514_vm1, %v1513_v5  ;;  %v118_v22 = vand.u32 127, %v117_v20  ;;  %v1165_v27 = vld [vmem:[%s1799_s2] ss:$0 sm:$0xff]  ;;  %vm802_vm9 = vcmask 259077   ;;  %s1517_s2 = smov 96   ;;  %vm463_vm10 = vcmask 256002  }
   0x7   :  { %1342 = vmatpush3.bf16.msra.mxu0 %v1585_v4  ;;  %vm689_vm11 = vcmask 258052   ;;  %vm915_vm12 = vcmask 260102   ;;  %vm1028_vm13 = vcmask 261127   ;;  %s1519_s17 = smov [#allocation5]  }
   0x8   :  { %1339 = vmatpush3.bf16.msra.mxu1 %v1600_v9  ;;  %1343 = vmatprep.subr.bf16.mxu0 %v1512_v3  ;;  %vm119_vm3 = vcmp.ge.s32.totalorder %v118_v22, 64  ;;  %vm120_vm4 = vcmp.lt.s32.totalorder %v118_v22, 96  ;;  %s1147_s18 = sshll.u32 %s1519_s17, 4  ;;  %s1148_s18 = int_to_ptr.vmem [resolvable:$true] %s1147_s18 }
   0x9   :  { %1346 = vmatprep.subr.bf16.mxu1 %v1512_v3  ;;  %vm1630_vm5 = vmand %vm119_vm3, %vm120_vm4 }
   0xb   :  { %1244 = vmatmul.mubr.msk.f32.vlgmr.msra.gmra.mrb[0].mxu1 %vm128_vm2, %v126_v10  ;;  %1345 = vmatpush3.bf16.msra.mxu0 %v1600_v9 }
   0xc   :  { %1348 = vmatpush3.bf16.msra.mxu1 %v1585_v4  ;;  %1265 = vmatprep.mubr.msk.f32.mxu1 %vm1514_vm1, %v1513_v5 }
   0xd   :  { %1349 = vmatprep.subr.bf16.mxu1 %v1512_v3  ;;  %1352 = vmatprep.subr.bf16.mxu0 %v1512_v3 }
  0x10   :  { %1351 = vmatpush3.bf16.msra.mxu1 %v1600_v9 }
  0x11   :  { %1358 = vmatprep.subr.bf16.mxu1 %v1512_v3 }
  0xd7   :  { %v113_v11 = vpop.f32.mrb[0].mxu0 }
  0xd8   :  { %v1234_v13 = vpop.f32.mrb[1].mxu0  ;;  %v1627_v14 = vadd.f32 %v1161_v12, %v113_v11 }
  0xde   :  { %v198_v15 = vpop.f32.mrb[0].mxu1 }
  0xdf   :  { %v202_v16 = vadd.f32 %v198_v15, %v1627_v14  ;;  %v1245_v17 = vpop.f32.mrb[1].mxu1 }
  0xe1   :  { %v1164_v18 = vmul.f32 -1.442695, %v202_v16 }
  0xe3   :  { %1396 = vpow2.f32 %v1164_v18 }
  0xe4   :  { %1398 = vtanh.f32 %v202_v16 }
  0xed   :  { %v1397_v19 = vpop.eup %1396 }
  0xee   :  { %v207_v21 = vadd.f32 1.0, %v1397_v19  ;;  %v1399_v24 = vpop.eup %1398 }
  0xf0   :  { %1400 = vrcp.f32 %v207_v21 }
  0xfa   :  { %v1401_v25 = vpop.eup %1400 }
  0xfb   :  { %v210_v26 = vsel %vm1630_vm5, %v1399_v24, %v1401_v25 }
  0xfc   :  { %221 = vrot.lane.b32.xlu0 %v210_v26, %s1515_s5 }
 0x100   :  { %216 = vrot.lane.b32.xlu0 %v1165_v27, %s1516_s27 }
 0x16e   :  { %v222_v28 = vpop.permute.xlu0 %221 }
 0x16f   :  { %v224_v29 = vmul.f32 %v222_v28, %v210_v26 }
 0x171   :  { %226 = vrot.lane.b32.xlu1 %v224_v29, %s1516_s27 }
 0x172   :  { %v217_v30 = vpop.permute.xlu0 %216 }
 0x173   :  { %v219_v31 = vmul.f32 %v217_v30, %v210_v26 }
 0x1e3   :  { %v227_v32 = vpop.permute.xlu1 %226 }
 0x1e4   :  { %v229_v33 = vadd.f32 %v227_v32, %v219_v31 }
 0x1e6   :  { %1402 = vtanh.f32 %v229_v33  ;;  %v327_v50 = vrot.slane %v229_v33, 7 }
 0x1f0   :  { %v1403_v34 = vpop.eup %1402 }
 0x1f1   :  { %232 = vrot.lane.b32.xlu1 %v1403_v34, %s1515_s5 }
 0x263   :  { %v233_v35 = vpop.permute.xlu1 %232 }
 0x264   :  { %v235_v36 = vmul.f32 %v233_v35, %v210_v26 }
 0x266   :  { %237 = vrot.lane.b32.xlu0 %v235_v36, %s1516_s27 }
 0x2d8   :  { %v238_v37 = vpop.permute.xlu0 %237 }
 0x2d9   :  { %241 = vst.msk [vmem:[#allocation2] sm:$0x1] %vm240_vm6, %v238_v37  ;;  %1255 = vmatmul.mubr.msk.f32.vlgmr.msra.gmra.mrb[2].mxu0 %vm128_vm2, %v238_v37 }
 0x2da   :  { %1354 = vmatpush3.bf16.msra.mxu0 %v1585_v4  ;;  %1276 = vmatprep.mubr.msk.f32.mxu0 %vm1514_vm1, %v1513_v5 }
 0x2db   :  { %1355 = vmatprep.subr.bf16.mxu0 %v1512_v3 }
 0x2de   :  { %1357 = vmatpush3.bf16.msra.mxu0 %v1600_v9 }
 0x2df   :  { %1364 = vmatprep.subr.bf16.mxu0 %v1512_v3 }
 0x3ac   :  { %v310_v38 = vpop.f32.mrb[2].mxu0 }
 0x3ad   :  { %v315_v39 = vrot.slane %v310_v38, 7  ;;  %v1256_v40 = vpop.f32.mrb[3].mxu0 }
 0x3af   :  { %v317_v41 = vadd.f32 %v315_v39, %v1627_v14 }
 0x3b1   :  { %v1167_v42 = vmul.f32 -1.442695, %v317_v41 }
 0x3b3   :  { %1404 = vpow2.f32 %v1167_v42 }
 0x3b4   :  { %1406 = vtanh.f32 %v317_v41 }
 0x3bd   :  { %v1405_v43 = vpop.eup %1404 }
 0x3be   :  { %v322_v44 = vadd.f32 1.0, %v1405_v43  ;;  %v1407_v45 = vpop.eup %1406 }
 0x3c0   :  { %1408 = vrcp.f32 %v322_v44 }
 0x3ca   :  { %v1409_v46 = vpop.eup %1408 }
 0x3cb   :  { %v325_v47 = vsel %vm1630_vm5, %v1407_v45, %v1409_v46 }
 0x3cc   :  { %331 = vrot.lane.b32.xlu1 %v325_v47, %s1515_s5  ;;  %v329_v51 = vmul.f32 %v327_v50, %v325_v47 }
 0x43e   :  { %v332_v48 = vpop.permute.xlu1 %331 }
 0x43f   :  { %v334_v49 = vmul.f32 %v332_v48, %v325_v47 }
 0x441   :  { %336 = vrot.lane.b32.xlu0 %v334_v49, %s1516_s27 }
 0x4b3   :  { %v337_v52 = vpop.permute.xlu0 %336 }
 0x4b4   :  { %v339_v53 = vadd.f32 %v337_v52, %v329_v51 }
 0x4b6   :  { %1410 = vtanh.f32 %v339_v53  ;;  %v440_v11 = vrot.slane %v339_v53, 7 }
 0x4c0   :  { %v1411_v54 = vpop.eup %1410 }
 0x4c1   :  { %342 = vrot.lane.b32.xlu1 %v1411_v54, %s1515_s5 }
 0x533   :  { %v343_v55 = vpop.permute.xlu1 %342 }
 0x534   :  { %v1657_v56 = vmul.f32 %v343_v55, %v325_v47 }
 0x536   :  { %v352_v57 = vrot.slane %v1657_v56, 1 }
 0x538   :  { %353 = vrot.lane.b32.xlu0 %v352_v57, %s1516_s27 }
 0x5aa   :  { %v354_v58 = vpop.permute.xlu0 %353 }
 0x5ab   :  { %1266 = vmatmul.mubr.msk.f32.vlgmr.msra.gmra.mrb[2].mxu1 %vm128_vm2, %v354_v58 }
 0x5ac   :  { %1360 = vmatpush3.bf16.msra.mxu1 %v1585_v4  ;;  %1287 = vmatprep.mubr.msk.f32.mxu1 %vm1514_vm1, %v1513_v5 }
 0x5ad   :  { %1361 = vmatprep.subr.bf16.mxu1 %v1512_v3 }
 0x5b0   :  { %1363 = vmatpush3.bf16.msra.mxu1 %v1600_v9 }
 0x5b1   :  { %1370 = vmatprep.subr.bf16.mxu1 %v1512_v3 }
 0x67e   :  { %v423_v59 = vpop.f32.mrb[2].mxu1 }
 0x67f   :  { %v428_v60 = vrot.slane %v423_v59, 6  ;;  %v1267_v61 = vpop.f32.mrb[3].mxu1 }
 0x681   :  { %v430_v62 = vadd.f32 %v428_v60, %v1627_v14 }
 0x683   :  { %v1169_v63 = vmul.f32 -1.442695, %v430_v62 }
 0x685   :  { %1412 = vpow2.f32 %v1169_v63 }
 0x686   :  { %1414 = vtanh.f32 %v430_v62 }
 0x68f   :  { %v1413_v0 = vpop.eup %1412 }
 0x690   :  { %v435_v1 = vadd.f32 1.0, %v1413_v0  ;;  %v1415_v2 = vpop.eup %1414 }
 0x692   :  { %1416 = vrcp.f32 %v435_v1 }
 0x69c   :  { %v1417_v6 = vpop.eup %1416 }
 0x69d   :  { %v438_v7 = vsel %vm1630_vm5, %v1415_v2, %v1417_v6 }
 0x69e   :  { %444 = vrot.lane.b32.xlu1 %v438_v7, %s1515_s5  ;;  %v442_v12 = vmul.f32 %v440_v11, %v438_v7 }
 0x710   :  { %v445_v8 = vpop.permute.xlu1 %444 }
 0x711   :  { %v447_v10 = vmul.f32 %v445_v8, %v438_v7 }
 0x713   :  { %449 = vrot.lane.b32.xlu0 %v447_v10, %s1516_s27 }
 0x785   :  { %v450_v13 = vpop.permute.xlu0 %449 }
 0x786   :  { %v452_v15 = vadd.f32 %v450_v13, %v442_v12 }
 0x788   :  { %1418 = vtanh.f32 %v452_v15  ;;  %v553_v34 = vrot.slane %v452_v15, 7 }
 0x792   :  { %v1419_v16 = vpop.eup %1418 }
 0x793   :  { %455 = vrot.lane.b32.xlu1 %v1419_v16, %s1515_s5 }
 0x805   :  { %v456_v17 = vpop.permute.xlu1 %455 }
 0x806   :  { %v1674_v18 = vmul.f32 %v456_v17, %v438_v7 }
 0x808   :  { %v465_v19 = vrot.slane %v1674_v18, 2 }
 0x80a   :  { %466 = vrot.lane.b32.xlu0 %v465_v19, %s1516_s27 }
 0x87c   :  { %v467_v20 = vpop.permute.xlu0 %466 }
 0x87d   :  { %1277 = vmatmul.mubr.msk.f32.vlgmr.msra.gmra.mrb[4].mxu0 %vm128_vm2, %v467_v20 }
 0x87e   :  { %1366 = vmatpush3.bf16.msra.mxu0 %v1585_v4  ;;  %1298 = vmatprep.mubr.msk.f32.mxu0 %vm1514_vm1, %v1513_v5 }
 0x87f   :  { %1367 = vmatprep.subr.bf16.mxu0 %v1512_v3 }
 0x882   :  { %1369 = vmatpush3.bf16.msra.mxu0 %v1600_v9 }
 0x883   :  { %1376 = vmatprep.subr.bf16.mxu0 %v1512_v3 }
 0x950   :  { %v536_v21 = vpop.f32.mrb[4].mxu0 }
 0x951   :  { %v541_v22 = vrot.slane %v536_v21, 5  ;;  %v1278_v24 = vpop.f32.mrb[5].mxu0 }
 0x953   :  { %v543_v25 = vadd.f32 %v541_v22, %v1627_v14 }
 0x955   :  { %v1171_v26 = vmul.f32 -1.442695, %v543_v25 }
 0x957   :  { %1420 = vpow2.f32 %v1171_v26 }
 0x958   :  { %1422 = vtanh.f32 %v543_v25 }
 0x961   :  { %v1421_v27 = vpop.eup %1420 }
 0x962   :  { %v548_v28 = vadd.f32 1.0, %v1421_v27  ;;  %v1423_v29 = vpop.eup %1422 }
 0x964   :  { %1424 = vrcp.f32 %v548_v28 }
 0x96e   :  { %v1425_v30 = vpop.eup %1424 }
 0x96f   :  { %v551_v31 = vsel %vm1630_vm5, %v1423_v29, %v1425_v30 }
 0x970   :  { %557 = vrot.lane.b32.xlu1 %v551_v31, %s1515_s5  ;;  %v555_v35 = vmul.f32 %v553_v34, %v551_v31 }
 0x9e2   :  { %v558_v32 = vpop.permute.xlu1 %557 }
 0x9e3   :  { %v560_v33 = vmul.f32 %v558_v32, %v551_v31 }
 0x9e5   :  { %562 = vrot.lane.b32.xlu0 %v560_v33, %s1516_s27 }
 0xa57   :  { %v563_v36 = vpop.permute.xlu0 %562 }
 0xa58   :  { %v565_v37 = vadd.f32 %v563_v36, %v555_v35 }
 0xa5a   :  { %1426 = vtanh.f32 %v565_v37  ;;  %v666_v55 = vrot.slane %v565_v37, 7 }
 0xa64   :  { %v1427_v38 = vpop.eup %1426 }
 0xa65   :  { %568 = vrot.lane.b32.xlu1 %v1427_v38, %s1515_s5 }
 0xad7   :  { %v569_v39 = vpop.permute.xlu1 %568 }
 0xad8   :  { %v1691_v40 = vmul.f32 %v569_v39, %v551_v31 }
 0xada   :  { %v578_v41 = vrot.slane %v1691_v40, 3 }
 0xadc   :  { %579 = vrot.lane.b32.xlu0 %v578_v41, %s1516_s27 }
 0xb4e   :  { %v580_v42 = vpop.permute.xlu0 %579 }
 0xb4f   :  { %1288 = vmatmul.mubr.msk.f32.vlgmr.msra.gmra.mrb[4].mxu1 %vm128_vm2, %v580_v42 }
 0xb50   :  { %1372 = vmatpush3.bf16.msra.mxu1 %v1585_v4  ;;  %1309 = vmatprep.mubr.msk.f32.mxu1 %vm1514_vm1, %v1513_v5 }
 0xb51   :  { %1373 = vmatprep.subr.bf16.mxu1 %v1512_v3 }
 0xb54   :  { %1375 = vmatpush3.bf16.msra.mxu1 %v1600_v9 }
 0xb55   :  { %1382 = vmatprep.subr.bf16.mxu1 %v1512_v3 }
 0xc22   :  { %v649_v43 = vpop.f32.mrb[4].mxu1 }
 0xc23   :  { %v654_v44 = vrot.slane %v649_v43, 4  ;;  %v1289_v45 = vpop.f32.mrb[5].mxu1 }
 0xc25   :  { %v656_v46 = vadd.f32 %v654_v44, %v1627_v14 }
 0xc27   :  { %v1173_v47 = vmul.f32 -1.442695, %v656_v46 }
 0xc29   :  { %1428 = vpow2.f32 %v1173_v47 }
 0xc2a   :  { %1430 = vtanh.f32 %v656_v46 }
 0xc33   :  { %v1429_v48 = vpop.eup %1428 }
 0xc34   :  { %v661_v49 = vadd.f32 1.0, %v1429_v48  ;;  %v1431_v50 = vpop.eup %1430 }
 0xc36   :  { %1432 = vrcp.f32 %v661_v49 }
 0xc40   :  { %v1433_v51 = vpop.eup %1432 }
 0xc41   :  { %v664_v52 = vsel %vm1630_vm5, %v1431_v50, %v1433_v51 }
 0xc42   :  { %670 = vrot.lane.b32.xlu1 %v664_v52, %s1515_s5  ;;  %v668_v57 = vmul.f32 %v666_v55, %v664_v52 }
 0xcb4   :  { %v671_v53 = vpop.permute.xlu1 %670 }
 0xcb5   :  { %v673_v54 = vmul.f32 %v671_v53, %v664_v52 }
 0xcb7   :  { %675 = vrot.lane.b32.xlu0 %v673_v54, %s1516_s27 }
 0xd29   :  { %v676_v58 = vpop.permute.xlu0 %675 }
 0xd2a   :  { %v678_v59 = vadd.f32 %v676_v58, %v668_v57 }
 0xd2c   :  { %1434 = vtanh.f32 %v678_v59  ;;  %v779_v16 = vrot.slane %v678_v59, 7 }
 0xd36   :  { %v1435_v60 = vpop.eup %1434 }
 0xd37   :  { %681 = vrot.lane.b32.xlu1 %v1435_v60, %s1515_s5 }
 0xda9   :  { %v682_v61 = vpop.permute.xlu1 %681 }
 0xdaa   :  { %v1708_v62 = vmul.f32 %v682_v61, %v664_v52 }
 0xdac   :  { %v691_v63 = vrot.slane %v1708_v62, 4 }
 0xdae   :  { %692 = vrot.lane.b32.xlu0 %v691_v63, %s1516_s27 }
 0xe20   :  { %v693_v0 = vpop.permute.xlu0 %692 }
 0xe21   :  { %1299 = vmatmul.mubr.msk.f32.vlgmr.msra.gmra.mrb[6].mxu0 %vm128_vm2, %v693_v0 }
 0xe22   :  { %1378 = vmatpush3.bf16.msra.mxu0 %v1585_v4  ;;  %1320 = vmatprep.mubr.msk.f32.mxu0 %vm1514_vm1, %v1513_v5 }
 0xe23   :  { %1379 = vmatprep.subr.bf16.mxu0 %v1512_v3 }
 0xe26   :  { %1381 = vmatpush3.bf16.msra.mxu0 %v1600_v9 }
 0xef4   :  { %v762_v1 = vpop.f32.mrb[6].mxu0 }
 0xef5   :  { %v767_v2 = vrot.slane %v762_v1, 3  ;;  %v1300_v6 = vpop.f32.mrb[7].mxu0 }
 0xef7   :  { %v769_v7 = vadd.f32 %v767_v2, %v1627_v14 }
 0xef9   :  { %v1175_v8 = vmul.f32 -1.442695, %v769_v7 }
 0xefb   :  { %1436 = vpow2.f32 %v1175_v8 }
 0xefc   :  { %1438 = vtanh.f32 %v769_v7 }
 0xf05   :  { %v1437_v10 = vpop.eup %1436 }
 0xf06   :  { %v774_v11 = vadd.f32 1.0, %v1437_v10  ;;  %v1439_v12 = vpop.eup %1438 }
 0xf08   :  { %1440 = vrcp.f32 %v774_v11 }
 0xf12   :  { %v1441_v4 = vpop.eup %1440 }
 0xf13   :  { %v777_v13 = vsel %vm1630_vm5, %v1439_v12, %v1441_v4 }
 0xf14   :  { %783 = vrot.lane.b32.xlu1 %v777_v13, %s1515_s5  ;;  %v781_v17 = vmul.f32 %v779_v16, %v777_v13 }
 0xf86   :  { %v784_v15 = vpop.permute.xlu1 %783 }
 0xf87   :  { %v786_v9 = vmul.f32 %v784_v15, %v777_v13 }
 0xf89   :  { %788 = vrot.lane.b32.xlu0 %v786_v9, %s1516_s27 }
 0xffb   :  { %v789_v19 = vpop.permute.xlu0 %788 }
 0xffc   :  { %v791_v20 = vadd.f32 %v789_v19, %v781_v17 }
 0xffe   :  { %1442 = vtanh.f32 %v791_v20  ;;  %v892_v38 = vrot.slane %v791_v20, 7 }
0x1008   :  { %v1443_v21 = vpop.eup %1442 }
0x1009   :  { %794 = vrot.lane.b32.xlu1 %v1443_v21, %s1515_s5 }
0x107b   :  { %v795_v22 = vpop.permute.xlu1 %794 }
0x107c   :  { %v797_v24 = vmul.f32 %v795_v22, %v777_v13 }
0x107e   :  { %v804_v25 = vrot.slane %v797_v24, 5 }
0x1080   :  { %805 = vrot.lane.b32.xlu0 %v804_v25, %s1516_s27 }
0x10f2   :  { %v806_v26 = vpop.permute.xlu0 %805 }
0x10f3   :  { %1310 = vmatmul.mubr.msk.f32.vlgmr.msra.gmra.mrb[6].mxu1 %vm128_vm2, %v806_v26 }
0x10f4   :  { %1331 = vmatprep.mubr.msk.f32.mxu1 %vm1514_vm1, %v1513_v5 }
0x11c6   :  { %v875_v27 = vpop.f32.mrb[6].mxu1 }
0x11c7   :  { %v880_v28 = vrot.slane %v875_v27, 2  ;;  %v1311_v29 = vpop.f32.mrb[7].mxu1 }
0x11c9   :  { %v882_v30 = vadd.f32 %v880_v28, %v1627_v14 }
0x11cb   :  { %v1177_v31 = vmul.f32 -1.442695, %v882_v30 }
0x11cd   :  { %1444 = vpow2.f32 %v1177_v31 }
0x11ce   :  { %1446 = vtanh.f32 %v882_v30 }
0x11d7   :  { %v1445_v32 = vpop.eup %1444 }
0x11d8   :  { %v887_v33 = vadd.f32 1.0, %v1445_v32  ;;  %v1447_v34 = vpop.eup %1446 }
0x11da   :  { %1448 = vrcp.f32 %v887_v33 }
0x11e4   :  { %v1449_v35 = vpop.eup %1448 }
0x11e5   :  { %v890_v36 = vsel %vm1630_vm5, %v1447_v34, %v1449_v35 }
0x11e6   :  { %896 = vrot.lane.b32.xlu1 %v890_v36, %s1515_s5  ;;  %v894_v39 = vmul.f32 %v892_v38, %v890_v36 }
0x1258   :  { %v897_v37 = vpop.permute.xlu1 %896 }
0x1259   :  { %v899_v5 = vmul.f32 %v897_v37, %v890_v36 }
0x125b   :  { %901 = vrot.lane.b32.xlu0 %v899_v5, %s1516_s27 }
0x12cd   :  { %v902_v41 = vpop.permute.xlu0 %901 }
0x12ce   :  { %v904_v42 = vadd.f32 %v902_v41, %v894_v39 }
0x12d0   :  { %1450 = vtanh.f32 %v904_v42 }
0x12da   :  { %v1451_v43 = vpop.eup %1450 }
0x12db   :  { %907 = vrot.lane.b32.xlu1 %v1451_v43, %s1515_s5 }
0x134d   :  { %v908_v44 = vpop.permute.xlu1 %907 }
0x134e   :  { %v910_v45 = vmul.f32 %v908_v44, %v890_v36 }
0x1350   :  { %v917_v46 = vrot.slane %v910_v45, 6 }
0x1352   :  { %918 = vrot.lane.b32.xlu0 %v917_v46, %s1516_s27 }
0x13c4   :  { %v919_v47 = vpop.permute.xlu0 %918 }
0x13c5   :  { %1321 = vmatmul.mubr.msk.f32.vlgmr.msra.gmra.mrb[8].mxu0 %vm128_vm2, %v919_v47 }
0x1498   :  { %v988_v48 = vpop.f32.mrb[8].mxu0 }
0x1499   :  { %v993_v49 = vrot.slane %v988_v48, 1  ;;  %v1322_v50 = vpop.f32.mrb[9].mxu0 }
0x149b   :  { %v995_v51 = vadd.f32 %v993_v49, %v1627_v14  ;;  %v1005_v14 = vrot.slane %v904_v42, 7 }
0x149d   :  { %v1179_v52 = vmul.f32 -1.442695, %v995_v51 }
0x149f   :  { %1452 = vpow2.f32 %v1179_v52 }
0x14a0   :  { %1454 = vtanh.f32 %v995_v51 }
0x14a9   :  { %v1453_v53 = vpop.eup %1452 }
0x14aa   :  { %v1000_v54 = vadd.f32 1.0, %v1453_v53  ;;  %v1455_v55 = vpop.eup %1454 }
0x14ac   :  { %1456 = vrcp.f32 %v1000_v54 }
0x14b6   :  { %v1457_v57 = vpop.eup %1456 }
0x14b7   :  { %v1003_v58 = vsel %vm1630_vm5, %v1455_v55, %v1457_v57 }
0x14b8   :  { %1009 = vrot.lane.b32.xlu1 %v1003_v58, %s1515_s5  ;;  %v1007_v61 = vmul.f32 %v1005_v14, %v1003_v58 }
0x152a   :  { %v1010_v59 = vpop.permute.xlu1 %1009 }
0x152b   :  { %v1012_v60 = vmul.f32 %v1010_v59, %v1003_v58 }
0x152d   :  { %1014 = vrot.lane.b32.xlu0 %v1012_v60, %s1516_s27 }
0x1531   :  { %347 = vrot.lane.b32.xlu0 %v1657_v56, %s1516_s27  ;;  %v1031_v56 = vld [vmem:[%s1803_s6] sm:$0xff] }
0x1535   :  { %573 = vrot.lane.b32.xlu0 %v1691_v40, %s1516_s27  ;;  %v1032_v40 = vld [vmem:[%s1803_s6 + $0x8] sm:$0xff] }
0x1536   :  { %v1383_v7 = vpack.c.bf16 %v1032_v40, %v1031_v56 }
0x1538   :  { %1384 = vmatpush3.bf16.msra.mxu1 %v1383_v7 }
0x1539   :  { %799 = vrot.lane.b32.xlu0 %v797_v24, %s1516_s27  ;;  %1385 = vmatprep.subr.bf16.mxu1 %v1512_v3 }
0x159f   :  { %v1015_v63 = vpop.permute.xlu0 %1014 }
0x15a0   :  { %v1017_v0 = vadd.f32 %v1015_v63, %v1007_v61 }
0x15a2   :  { %1458 = vtanh.f32 %v1017_v0 }
0x15a3   :  { %v348_v23 = vpop.permute.xlu0 %347 }
0x15a4   :  { %351 = vst.msk [vmem:[#allocation2] sm:$0x2] %vm350_vm7, %v348_v23 }
0x15a7   :  { %v574_v1 = vpop.permute.xlu0 %573 }
0x15a8   :  { %577 = vst.msk [vmem:[#allocation2] sm:$0x8] %vm576_vm8, %v574_v1 }
0x15ab   :  { %v800_v2 = vpop.permute.xlu0 %799 }
0x15ac   :  { %v1459_v6 = vpop.eup %1458  ;;  %803 = vst.msk [vmem:[#allocation2] sm:$0x20] %vm802_vm9, %v800_v2 }
0x15ad   :  { %1020 = vrot.lane.b32.xlu1 %v1459_v6, %s1515_s5 }
0x15b1   :  { %460 = vrot.lane.b32.xlu1 %v1674_v18, %s1516_s27  ;;  %v1033_v18 = vld [vmem:[%s1803_s6 + $0x10] sm:$0xff] }
0x15b5   :  { %686 = vrot.lane.b32.xlu1 %v1708_v62, %s1516_s27  ;;  %v1034_v62 = vld [vmem:[%s1803_s6 + $0x18] sm:$0xff]  ;;  %s1518_s6 = smov [#allocation3]  }
0x15b6   :  { %v1386_v8 = vpack.c.bf16 %v1034_v62, %v1033_v18  ;;  %s1137_s16 = sshll.u32 %s1518_s6, 4  ;;  %s1138_s16 = int_to_ptr.vmem [resolvable:$true] %s1137_s16 }
0x15b7   :  { %s1464_s19 = scalar_lea.vmem %s1138_s16, 16  ;;  %s1468_s20 = scalar_lea.vmem %s1138_s16, 32 }
0x15b8   :  { %1387 = vmatpush3.bf16.msra.mxu1 %v1386_v8  ;;  %p1465_p0 = scmp.ne.s32.totalorder %s1138_s16, %s1464_s19  ;;  %p1469_p1 = scmp.lt.s32.totalorder %s1138_s16, %s1138_s16 }
0x15b9   :  { %912 = vrot.lane.b32.xlu1 %v910_v45, %s1516_s27  ;;  %p1470_p2 = scmp.lt.s32.totalorder %s1468_s20, %s1464_s19 }
0x15bb   :  { %p1471_p3 = por %p1470_p2, %p1469_p1 }
0x15bd   :  { %1125 = vrot.lane.b32.xlu1 %v1017_v0, %s1517_s2  ;;  %p1472_p4 = pnand %p1471_p3, %p1465_p0 }
0x161f   :  { %v1021_v10 = vpop.permute.xlu1 %1020 }
0x1620   :  { %v1023_v11 = vmul.f32 %v1021_v10, %v1003_v58 }
0x1622   :  { %1025 = vrot.lane.b32.xlu0 %v1023_v11, %s1516_s27 }
0x1623   :  { %v461_v12 = vpop.permute.xlu1 %460 }
0x1624   :  { %464 = vst.msk [vmem:[#allocation2] sm:$0x4] %vm463_vm10, %v461_v12 }
0x1627   :  { %v687_v4 = vpop.permute.xlu1 %686 }
0x1628   :  { %690 = vst.msk [vmem:[#allocation2] sm:$0x10] %vm689_vm11, %v687_v4 }
0x162b   :  { %v913_v13 = vpop.permute.xlu1 %912 }
0x162c   :  { %916 = vst.msk [vmem:[#allocation2] sm:$0x40] %vm915_vm12, %v913_v13 }
0x162f   :  { %v1126_v15 = vpop.permute.xlu1 %1125 }
0x1630   :  { %1128 = vst.msk [vmem:[#allocation5 - $0x7] sm:$0x80] %vm1028_vm13, %v1126_v15 }
0x1694   :  { %v1026_v9 = vpop.permute.xlu0 %1025 }
0x1695   :  { %1029 = vst.msk [vmem:[#allocation2] sm:$0x80] %vm1028_vm13, %v1026_v9  ;;  %1123 = vst.msk [vmem:[#allocation3 - $0x7] sm:$0x80] %vm1028_vm13, %v1026_v9 }
0x169c   :  { %v1030_v3 = vld [vmem:[#allocation2] sm:$0xff] }
0x169d   :  { %1332 = vmatmul.mubr.msk.f32.vlgmr.msra.gmra.mrb[8].mxu1 %vm128_vm2, %v1030_v3 }
0x169e   :  { %1475 = shalt.err (!%p1472_p4)
}
0x169f   :  { %s1476_s23 = scalar_lea.hbm %s1806_s9, 16 }
0x16a0   :  { %p1477_p5 = scmp.ne.s32.totalorder %s1806_s9, %s1476_s23  ;;  %p1480_p6 = scmp.lt.u32.totalorder %s1476_s23, %s1806_s9 }
0x16a2   :  { %p1482_p7 = pnand %p1480_p6, %p1477_p5 }
0x16a4   :  { %1485 = shalt.err (!%p1482_p7)
}
0x16a5   :  { %1140 = dma.vmem_to_hbm [thread:$0]  %s1138_s16, 16, %s1806_s9, [#allocation4]  }
0x16a6   :  { %s1486_s25 = scalar_lea.vmem %s1148_s18, 16  ;;  %s1490_s26 = scalar_lea.vmem %s1148_s18, 32 }
0x16a7   :  { %p1487_p8 = scmp.ne.s32.totalorder %s1148_s18, %s1486_s25  ;;  %p1491_p9 = scmp.lt.s32.totalorder %s1148_s18, %s1148_s18 }
0x16a8   :  { %p1492_p10 = scmp.lt.s32.totalorder %s1490_s26, %s1486_s25 }
0x16aa   :  { %p1493_p11 = por %p1492_p10, %p1491_p9 }
0x16ac   :  { %p1494_p12 = pnand %p1493_p11, %p1487_p8 }
0x16ae   :  { %1497 = shalt.err (!%p1494_p12)
}
0x16af   :  { %s1498_s28 = scalar_lea.hbm %s1807_s10, 16 }
0x16b0   :  { %p1499_p13 = scmp.ne.s32.totalorder %s1807_s10, %s1498_s28  ;;  %p1502_p0 = scmp.lt.u32.totalorder %s1498_s28, %s1807_s10 }
0x16b2   :  { %p1504_p1 = pnand %p1502_p0, %p1499_p13 }
0x16b4   :  { %1507 = shalt.err (!%p1504_p1)
}
0x16b5   :  { %1150 = dma.vmem_to_hbm [thread:$0]  %s1148_s18, 16, %s1807_s10, [#allocation6]   ;;  %v1180_v16 = vld [vmem:[%s1804_s7] ss:$0 sm:$0xff]  ;;  %vm1121_vm14 = vcmask 31744  }
0x1770   :  { %v1111_v17 = vpop.f32.mrb[8].mxu1 }
0x1771   :  { %v1112_v19 = vadd.f32 %v1180_v16, %v1111_v17  ;;  %v1333_v20 = vpop.f32.mrb[9].mxu1 }
0x1773   :  { %v1182_v21 = vmul.f32 -1.442695, %v1112_v19 }
0x1775   :  { %1460 = vpow2.f32 %v1182_v21 }
0x177f   :  { %v1461_v22 = vpop.eup %1460 }
0x1780   :  { %v1118_v24 = vadd.f32 1.0, %v1461_v22 }
0x1782   :  { %1462 = vrcp.f32 %v1118_v24 }
0x178c   :  { %v1463_v25 = vpop.eup %1462 }
0x178d   :  { %1122 = vst.msk [vmem:[%s1805_s8] sm:$0xff] %vm1121_vm14, %v1463_v25 }
0x178e   :  { %1508 = dma.done.wait [#allocation4], 16  }
0x178f   :  { %1509 = vsyncadd [#allocation4], 4294967280 }
0x1790   :  { %1510 = dma.done.wait [#allocation6], 16  }
0x1791   :  { %1511 = vsyncadd [#allocation6], 4294967280 }
0x1792   :  { %1159 = vsyncpa [#allocation4], 1 }
0x1793   :  { %1160 = vsyncpa [#allocation6], 1 }

</bundles_post_ra>
